<compile_context>
chip_gen: v7x
topology: tpu7x:2x2x1
jax: 0.10.0
libtpu: 0.0.40
codegen_flags: <defaults>
</compile_context>

<pallas_src>
import functools

import jax
import jax.numpy as jnp
from jax.experimental import pallas as pl
from jax.experimental.pallas import tpu as pltpu

LANE = 128     # lane width
SUBLANE = 8    # f32 sublane width


def _round_up(x, m):
    return (x + m - 1) // m * m


def _qnet_kernel(action_size,
                 x_ref,
                 w1_ref, b1_ref,
                 w2_ref, b2_ref,
                 w3_ref, b3_ref,
                 wh_ref, bh_ref,    # fused [fc_value | fc_adv]
                 wf_ref, bf_ref,    # fused block-diagonal [value | adv]
                 out_ref):
    def layer(h, w_ref, b_ref, relu=True):
        # bf16 operands on the MXU, f32 accumulation, f32 epilogue.
        y = jnp.dot(h, w_ref[...], preferred_element_type=jnp.float32) + b_ref[...]
        if relu:
            y = jnp.maximum(y, 0.0)
        return y

    x = x_ref[...]                                        # bf16 (BT, S_pad)
    h = layer(x, w1_ref, b1_ref).astype(jnp.bfloat16)
    h = layer(h, w2_ref, b2_ref).astype(jnp.bfloat16)
    h = layer(h, w3_ref, b3_ref).astype(jnp.bfloat16)
    h = layer(h, wh_ref, bh_ref).astype(jnp.bfloat16)     # [value-hidden | adv-hidden | 0]
    o = layer(h, wf_ref, bf_ref, relu=False)              # f32: col0=value, cols 1..A=adv, rest exactly 0

    value = o[:, 0:1]                                     # (BT, 1)
    # Padded columns of `o` are exactly zero (zero-padded weights + bias), so
    # a full-lane sum minus the value column equals the sum over the real
    # advantage columns.
    adv_sum = jnp.sum(o, axis=-1, keepdims=True) - value
    adv_avg = adv_sum * (1.0 / action_size)

    lane = jax.lax.broadcasted_iota(jnp.int32, o.shape, 1)
    # Column 0 keeps the raw value; columns >= 1 hold q = value + adv - adv_avg.
    out_ref[...] = jnp.where(lane == 0, o, o + value - adv_avg).astype(out_ref.dtype)


@functools.partial(jax.jit, static_argnames=("action_size",))
def qnetwork_forward(state, prepared, action_size):
    """Dueling-DQN forward in one Pallas kernel.

    state: (B, state_size) f32
    prepared: dict from prepare_params() (fused, padded, bf16 weights)
    returns (q, value) with shapes (B, action_size), (B, 1), both f32.
    """
    B, S = state.shape
    S_pad = prepared["w1"].shape[0]
    OUT_pad = prepared["w_final"].shape[1]

    # Batch padding / tiling: multiples of 8 sublanes; cap the tile so large
    # replay batches pipeline and (on v7x) shard across the two TensorCores.
    B_pad = _round_up(B, SUBLANE)
    BT = min(B_pad, 256)
    B_pad = _round_up(B_pad, BT)

    x = jnp.pad(state, ((0, B_pad - B), (0, S_pad - S))).astype(jnp.bfloat16)

    weights = (
        prepared["w1"], prepared["b1"],
        prepared["w2"], prepared["b2"],
        prepared["w3"], prepared["b3"],
        prepared["w_head"], prepared["b_head"],
        prepared["w_final"], prepared["b_final"],
    )

    def _const_map(i):           # weights/biases stay VMEM-resident across the grid
        return (0, 0)

    in_specs = [pl.BlockSpec((BT, S_pad), lambda i: (i, 0))]
    in_specs += [pl.BlockSpec(p.shape, _const_map) for p in weights]

    out = pl.pallas_call(
        functools.partial(_qnet_kernel, action_size),
        grid=(B_pad // BT,),
        in_specs=in_specs,
        out_specs=pl.BlockSpec((BT, OUT_pad), lambda i: (i, 0)),
        out_shape=jax.ShapeDtypeStruct((B_pad, OUT_pad), jnp.float32),
        compiler_params=pltpu.CompilerParams(
            dimension_semantics=("parallel",),
        ),
    )(x, *weights)

    value = out[:B, 0:1]
    q = out[:B, 1:1 + action_size]
    return q, value


def init_params(key, state_size, action_size, n_neurons):
    """Deterministic synthetic init of all nn.Linear layers (weights as (in, out))."""
    dims = [
        ("w1", "b1", state_size, n_neurons[0]),
        ("w2", "b2", n_neurons[0], n_neurons[1]),
        ("w3", "b3", n_neurons[1], n_neurons[2]),
        ("w_fc_value", "b_fc_value", n_neurons[2], n_neurons[3]),
        ("w_value", "b_value", n_neurons[3], 1),
        ("w_fc_adv", "b_fc_adv", n_neurons[2], n_neurons[3]),
        ("w_adv", "b_adv", n_neurons[3], action_size),
    ]
    params = {}
    for wname, bname, fan_in, fan_out in dims:
        key, kw, kb = jax.random.split(key, 3)
        bound = 1.0 / jnp.sqrt(fan_in)  # PyTorch default Linear init scale
        params[wname] = jax.random.uniform(kw, (fan_in, fan_out), jnp.float32, -bound, bound)
        params[bname] = jax.random.uniform(kb, (1, fan_out), jnp.float32, -bound, bound)
    return params


def prepare_params(params, action_size):
    """Fuse value/adv head layers, zero-pad feature dims to 128, cast W to bf16."""
    def pad_w(w):
        r = _round_up(w.shape[0], LANE)
        c = _round_up(w.shape[1], LANE)
        return jnp.pad(w, ((0, r - w.shape[0]), (0, c - w.shape[1]))).astype(jnp.bfloat16)

    def pad_b(b):
        c = _round_up(b.shape[1], LANE)
        return jnp.pad(b, ((0, 0), (0, c - b.shape[1]))).astype(jnp.float32)

    h4 = params["w_value"].shape[0]

    # Fused head-input layer: [fc_value | fc_adv].
    w_head = jnp.concatenate([params["w_fc_value"], params["w_fc_adv"]], axis=1)
    b_head = jnp.concatenate([params["b_fc_value"], params["b_fc_adv"]], axis=1)

    # Fused block-diagonal output layer: column 0 = value, columns 1..A = adv.
    w_final = jnp.zeros((2 * h4, 1 + action_size), jnp.float32)
    w_final = w_final.at[:h4, 0:1].set(params["w_value"])
    w_final = w_final.at[h4:, 1:1 + action_size].set(params["w_adv"])
    b_final = jnp.concatenate([params["b_value"], params["b_adv"]], axis=1)

    return {
        "w1": pad_w(params["w1"]), "b1": pad_b(params["b1"]),
        "w2": pad_w(params["w2"]), "b2": pad_b(params["b2"]),
        "w3": pad_w(params["w3"]), "b3": pad_b(params["b3"]),
        "w_head": pad_w(w_head), "b_head": pad_b(b_head),
        "w_final": pad_w(w_final), "b_final": pad_b(b_final),
    }


def reference_forward(state, params, use_bf16=True):
    """Pure-JAX reference of the PyTorch forward (optionally bf16-matched)."""
    def lin(h, w, b):
        if use_bf16:
            h = h.astype(jnp.bfloat16)
            w = w.astype(jnp.bfloat16)
        return jnp.dot(h, w, preferred_element_type=jnp.float32) + b

    relu = jax.nn.relu
    h = relu(lin(state, params["w1"], params["b1"]))
    h = relu(lin(h, params["w2"], params["b2"]))
    h = relu(lin(h, params["w3"], params["b3"]))
    v = relu(lin(h, params["w_fc_value"], params["b_fc_value"]))
    v = lin(v, params["w_value"], params["b_value"])
    a = relu(lin(h, params["w_fc_adv"], params["b_fc_adv"]))
    a = lin(a, params["w_adv"], params["b_adv"])
    q = v + a - jnp.mean(a, axis=-1, keepdims=True)
    return q, v


if __name__ == "__main__":
    state_size = 8
    action_size = 4
    n_neurons = [32, 32, 32, 32]
    batch = 2

    key = jax.random.PRNGKey(0)
    key, pkey, skey = jax.random.split(key, 3)
    params = init_params(pkey, state_size, action_size, n_neurons)
    prepared = prepare_params(params, action_size)
    state = jax.random.normal(skey, (batch, state_size), jnp.float32)

    q, value = qnetwork_forward(state, prepared, action_size)
    jax.block_until_ready((q, value))

    q_ref, v_ref = reference_forward(state, params, use_bf16=True)
    assert q.shape == (batch, action_size)
    assert value.shape == (batch, 1)
    assert jnp.allclose(q, q_ref, atol=2e-3, rtol=1e-3), "q mismatch vs reference"
    assert jnp.allclose(value, v_ref, atol=2e-3, rtol=1e-3), "value mismatch vs reference"

    print("KERNEL_OK")
</pallas_src>

<mosaic_0001>
module attributes {stable_mosaic.version = 11 : i64} {
  func.func @_qnet_kernel(%arg0: i32, %arg1: memref<8x128xbf16, #tpu.memory_space<vmem>>, %arg2: memref<128x128xbf16, #tpu.memory_space<vmem>>, %arg3: memref<1x128xf32, #tpu.memory_space<vmem>>, %arg4: memref<128x128xbf16, #tpu.memory_space<vmem>>, %arg5: memref<1x128xf32, #tpu.memory_space<vmem>>, %arg6: memref<128x128xbf16, #tpu.memory_space<vmem>>, %arg7: memref<1x128xf32, #tpu.memory_space<vmem>>, %arg8: memref<128x128xbf16, #tpu.memory_space<vmem>>, %arg9: memref<1x128xf32, #tpu.memory_space<vmem>>, %arg10: memref<128x128xbf16, #tpu.memory_space<vmem>>, %arg11: memref<1x128xf32, #tpu.memory_space<vmem>>, %arg12: memref<8x128xf32, #tpu.memory_space<vmem>>) attributes {dimension_semantics = [#tpu.dimension_semantics<parallel>], iteration_bounds = array<i64: 1>, scalar_prefetch = 0 : i64, scratch_operands = 0 : i64, tpu.core_type = #tpu.core_type<tc>, window_params = [{transform_indices = @transform_0, window_bounds = array<i64: 8, 128>}, {pipeline_mode = #tpu.pipeline_mode<synchronous>, transform_indices = @transform_1, window_bounds = array<i64: 128, 128>}, {pipeline_mode = #tpu.pipeline_mode<synchronous>, transform_indices = @transform_2, window_bounds = array<i64: 1, 128>}, {pipeline_mode = #tpu.pipeline_mode<synchronous>, transform_indices = @transform_3, window_bounds = array<i64: 128, 128>}, {pipeline_mode = #tpu.pipeline_mode<synchronous>, transform_indices = @transform_4, window_bounds = array<i64: 1, 128>}, {pipeline_mode = #tpu.pipeline_mode<synchronous>, transform_indices = @transform_5, window_bounds = array<i64: 128, 128>}, {pipeline_mode = #tpu.pipeline_mode<synchronous>, transform_indices = @transform_6, window_bounds = array<i64: 1, 128>}, {pipeline_mode = #tpu.pipeline_mode<synchronous>, transform_indices = @transform_7, window_bounds = array<i64: 128, 128>}, {pipeline_mode = #tpu.pipeline_mode<synchronous>, transform_indices = @transform_8, window_bounds = array<i64: 1, 128>}, {pipeline_mode = #tpu.pipeline_mode<synchronous>, transform_indices = @transform_9, window_bounds = array<i64: 128, 128>}, {pipeline_mode = #tpu.pipeline_mode<synchronous>, transform_indices = @transform_10, window_bounds = array<i64: 1, 128>}, {transform_indices = @transform_11, window_bounds = array<i64: 8, 128>}]} {
    %c0 = arith.constant 0 : index
    %c0_0 = arith.constant 0 : index
    %0 = vector.load %arg1[%c0, %c0_0] : memref<8x128xbf16, #tpu.memory_space<vmem>>, vector<8x128xbf16>
    %c0_1 = arith.constant 0 : index
    %c0_2 = arith.constant 0 : index
    %1 = vector.load %arg2[%c0_1, %c0_2] : memref<128x128xbf16, #tpu.memory_space<vmem>>, vector<128x128xbf16>
    %cst = arith.constant dense<0.000000e+00> : vector<8x128xf32>
    %2 = tpu.matmul %0, %1, %cst {dimension_numbers = #tpu.dot_dimension_numbers<[1], [0], [0], [1], [0, 0, 1, 1], [], []>} : vector<8x128xbf16>, vector<128x128xbf16>, vector<8x128xf32> -> vector<8x128xf32>
    %c0_3 = arith.constant 0 : index
    %c0_4 = arith.constant 0 : index
    %3 = vector.load %arg3[%c0_3, %c0_4] : memref<1x128xf32, #tpu.memory_space<vmem>>, vector<1x128xf32>
    %4 = vector.broadcast %3 : vector<1x128xf32> to vector<8x128xf32>
    %5 = arith.addf %2, %4 : vector<8x128xf32>
    %cst_5 = arith.constant 0.000000e+00 : f32
    %6 = vector.broadcast %cst_5 : f32 to vector<8x128xf32>
    %7 = arith.maximumf %5, %6 : vector<8x128xf32>
    %8 = arith.truncf %7 : vector<8x128xf32> to vector<8x128xbf16>
    %c0_6 = arith.constant 0 : index
    %c0_7 = arith.constant 0 : index
    %9 = vector.load %arg4[%c0_6, %c0_7] : memref<128x128xbf16, #tpu.memory_space<vmem>>, vector<128x128xbf16>
    %cst_8 = arith.constant dense<0.000000e+00> : vector<8x128xf32>
    %10 = tpu.matmul %8, %9, %cst_8 {dimension_numbers = #tpu.dot_dimension_numbers<[1], [0], [0], [1], [0, 0, 1, 1], [], []>} : vector<8x128xbf16>, vector<128x128xbf16>, vector<8x128xf32> -> vector<8x128xf32>
    %c0_9 = arith.constant 0 : index
    %c0_10 = arith.constant 0 : index
    %11 = vector.load %arg5[%c0_9, %c0_10] : memref<1x128xf32, #tpu.memory_space<vmem>>, vector<1x128xf32>
    %12 = vector.broadcast %11 : vector<1x128xf32> to vector<8x128xf32>
    %13 = arith.addf %10, %12 : vector<8x128xf32>
    %cst_11 = arith.constant 0.000000e+00 : f32
    %14 = vector.broadcast %cst_11 : f32 to vector<8x128xf32>
    %15 = arith.maximumf %13, %14 : vector<8x128xf32>
    %16 = arith.truncf %15 : vector<8x128xf32> to vector<8x128xbf16>
    %c0_12 = arith.constant 0 : index
    %c0_13 = arith.constant 0 : index
    %17 = vector.load %arg6[%c0_12, %c0_13] : memref<128x128xbf16, #tpu.memory_space<vmem>>, vector<128x128xbf16>
    %cst_14 = arith.constant dense<0.000000e+00> : vector<8x128xf32>
    %18 = tpu.matmul %16, %17, %cst_14 {dimension_numbers = #tpu.dot_dimension_numbers<[1], [0], [0], [1], [0, 0, 1, 1], [], []>} : vector<8x128xbf16>, vector<128x128xbf16>, vector<8x128xf32> -> vector<8x128xf32>
    %c0_15 = arith.constant 0 : index
    %c0_16 = arith.constant 0 : index
    %19 = vector.load %arg7[%c0_15, %c0_16] : memref<1x128xf32, #tpu.memory_space<vmem>>, vector<1x128xf32>
    %20 = vector.broadcast %19 : vector<1x128xf32> to vector<8x128xf32>
    %21 = arith.addf %18, %20 : vector<8x128xf32>
    %cst_17 = arith.constant 0.000000e+00 : f32
    %22 = vector.broadcast %cst_17 : f32 to vector<8x128xf32>
    %23 = arith.maximumf %21, %22 : vector<8x128xf32>
    %24 = arith.truncf %23 : vector<8x128xf32> to vector<8x128xbf16>
    %c0_18 = arith.constant 0 : index
    %c0_19 = arith.constant 0 : index
    %25 = vector.load %arg8[%c0_18, %c0_19] : memref<128x128xbf16, #tpu.memory_space<vmem>>, vector<128x128xbf16>
    %cst_20 = arith.constant dense<0.000000e+00> : vector<8x128xf32>
    %26 = tpu.matmul %24, %25, %cst_20 {dimension_numbers = #tpu.dot_dimension_numbers<[1], [0], [0], [1], [0, 0, 1, 1], [], []>} : vector<8x128xbf16>, vector<128x128xbf16>, vector<8x128xf32> -> vector<8x128xf32>
    %c0_21 = arith.constant 0 : index
    %c0_22 = arith.constant 0 : index
    %27 = vector.load %arg9[%c0_21, %c0_22] : memref<1x128xf32, #tpu.memory_space<vmem>>, vector<1x128xf32>
    %28 = vector.broadcast %27 : vector<1x128xf32> to vector<8x128xf32>
    %29 = arith.addf %26, %28 : vector<8x128xf32>
    %cst_23 = arith.constant 0.000000e+00 : f32
    %30 = vector.broadcast %cst_23 : f32 to vector<8x128xf32>
    %31 = arith.maximumf %29, %30 : vector<8x128xf32>
    %32 = arith.truncf %31 : vector<8x128xf32> to vector<8x128xbf16>
    %c0_24 = arith.constant 0 : index
    %c0_25 = arith.constant 0 : index
    %33 = vector.load %arg10[%c0_24, %c0_25] : memref<128x128xbf16, #tpu.memory_space<vmem>>, vector<128x128xbf16>
    %cst_26 = arith.constant dense<0.000000e+00> : vector<8x128xf32>
    %34 = tpu.matmul %32, %33, %cst_26 {dimension_numbers = #tpu.dot_dimension_numbers<[1], [0], [0], [1], [0, 0, 1, 1], [], []>} : vector<8x128xbf16>, vector<128x128xbf16>, vector<8x128xf32> -> vector<8x128xf32>
    %c0_27 = arith.constant 0 : index
    %c0_28 = arith.constant 0 : index
    %35 = vector.load %arg11[%c0_27, %c0_28] : memref<1x128xf32, #tpu.memory_space<vmem>>, vector<1x128xf32>
    %36 = vector.broadcast %35 : vector<1x128xf32> to vector<8x128xf32>
    %37 = arith.addf %34, %36 : vector<8x128xf32>
    %38 = vector.extract_strided_slice %37 {offsets = [0, 0], sizes = [8, 1], strides = [1, 1]} : vector<8x128xf32> to vector<8x1xf32>
    %cst_29 = arith.constant dense<0.000000e+00> : vector<8xf32>
    %39 = vector.multi_reduction <add>, %37, %cst_29 [1] : vector<8x128xf32> to vector<8xf32>
    %40 = vector.shape_cast %39 : vector<8xf32> to vector<8x1xf32>
    %41 = arith.subf %40, %38 : vector<8x1xf32>
    %cst_30 = arith.constant 2.500000e-01 : f32
    %42 = vector.broadcast %cst_30 : f32 to vector<8x1xf32>
    %43 = arith.mulf %41, %42 : vector<8x1xf32>
    %44 = tpu.iota {dimensions = array<i32: 1>} : vector<8x128xi32>
    %c0_i32 = arith.constant 0 : i32
    %45 = vector.broadcast %c0_i32 : i32 to vector<8x128xi32>
    %46 = arith.cmpi eq, %44, %45 : vector<8x128xi32>
    %47 = vector.broadcast %38 : vector<8x1xf32> to vector<8x128xf32>
    %48 = arith.addf %37, %47 : vector<8x128xf32>
    %49 = vector.broadcast %43 : vector<8x1xf32> to vector<8x128xf32>
    %50 = arith.subf %48, %49 : vector<8x128xf32>
    %51 = arith.select %46, %37, %50 : vector<8x128xi1>, vector<8x128xf32>
    %c0_31 = arith.constant 0 : index
    %c0_32 = arith.constant 0 : index
    %52 = vector.load %arg12[%c0_31, %c0_32] : memref<8x128xf32, #tpu.memory_space<vmem>>, vector<8x128xf32>
    tpu.vector_store %arg12[%c0_31, %c0_32], %51 {strides = array<i32>} : memref<8x128xf32, #tpu.memory_space<vmem>>, vector<8x128xf32>,
    return
  }
  func.func @transform_0(%arg0: i32) -> (i32, i32) {
    %c0_i32 = arith.constant 0 : i32
    %c0_i32_0 = arith.constant 0 : i32
    return %arg0, %c0_i32 : i32, i32
  }
  func.func @transform_1(%arg0: i32) -> (i32, i32) {
    %c0_i32 = arith.constant 0 : i32
    %c0_i32_0 = arith.constant 0 : i32
    %c0_i32_1 = arith.constant 0 : i32
    return %c0_i32, %c0_i32_0 : i32, i32
  }
  func.func @transform_2(%arg0: i32) -> (i32, i32) {
    %c0_i32 = arith.constant 0 : i32
    %c0_i32_0 = arith.constant 0 : i32
    %c0_i32_1 = arith.constant 0 : i32
    return %c0_i32, %c0_i32_0 : i32, i32
  }
  func.func @transform_3(%arg0: i32) -> (i32, i32) {
    %c0_i32 = arith.constant 0 : i32
    %c0_i32_0 = arith.constant 0 : i32
    %c0_i32_1 = arith.constant 0 : i32
    return %c0_i32, %c0_i32_0 : i32, i32
  }
  func.func @transform_4(%arg0: i32) -> (i32, i32) {
    %c0_i32 = arith.constant 0 : i32
    %c0_i32_0 = arith.constant 0 : i32
    %c0_i32_1 = arith.constant 0 : i32
    return %c0_i32, %c0_i32_0 : i32, i32
  }
  func.func @transform_5(%arg0: i32) -> (i32, i32) {
    %c0_i32 = arith.constant 0 : i32
    %c0_i32_0 = arith.constant 0 : i32
    %c0_i32_1 = arith.constant 0 : i32
    return %c0_i32, %c0_i32_0 : i32, i32
  }
  func.func @transform_6(%arg0: i32) -> (i32, i32) {
    %c0_i32 = arith.constant 0 : i32
    %c0_i32_0 = arith.constant 0 : i32
    %c0_i32_1 = arith.constant 0 : i32
    return %c0_i32, %c0_i32_0 : i32, i32
  }
  func.func @transform_7(%arg0: i32) -> (i32, i32) {
    %c0_i32 = arith.constant 0 : i32
    %c0_i32_0 = arith.constant 0 : i32
    %c0_i32_1 = arith.constant 0 : i32
    return %c0_i32, %c0_i32_0 : i32, i32
  }
  func.func @transform_8(%arg0: i32) -> (i32, i32) {
    %c0_i32 = arith.constant 0 : i32
    %c0_i32_0 = arith.constant 0 : i32
    %c0_i32_1 = arith.constant 0 : i32
    return %c0_i32, %c0_i32_0 : i32, i32
  }
  func.func @transform_9(%arg0: i32) -> (i32, i32) {
    %c0_i32 = arith.constant 0 : i32
    %c0_i32_0 = arith.constant 0 : i32
    %c0_i32_1 = arith.constant 0 : i32
    return %c0_i32, %c0_i32_0 : i32, i32
  }
  func.func @transform_10(%arg0: i32) -> (i32, i32) {
    %c0_i32 = arith.constant 0 : i32
    %c0_i32_0 = arith.constant 0 : i32
    %c0_i32_1 = arith.constant 0 : i32
    return %c0_i32, %c0_i32_0 : i32, i32
  }
  func.func @transform_11(%arg0: i32) -> (i32, i32) {
    %c0_i32 = arith.constant 0 : i32
    %c0_i32_0 = arith.constant 0 : i32
    return %arg0, %c0_i32 : i32, i32
  }
}

</mosaic_0001>

<bundles_post_ra>
// kernel: qnetwork_forward.1
= control target key start
LH: loop header
LB: loop body
LE: loop exit
PB: predicated region body
PF: predicated region fallthrough
CT: control target
= control target key end

     0   :  { %16 = vsyncpa [#allocation3], 0  ;;  %s1287_s0 = inlined_call_operand.vmem [shape: bf16[8,128], index: 0, kind: input, shape index: {}]   ;;  %s1288_s1 = inlined_call_operand.hbm [shape: bf16[128,128], index: 1, kind: input, shape index: {}]   ;;  %s1289_s2 = inlined_call_operand.vmem [shape: f32[1,128], index: 2, kind: input, shape index: {}]   ;;  %s1290_s3 = inlined_call_operand.hbm [shape: bf16[128,128], index: 3, kind: input, shape index: {}]   ;;  %s1291_s4 = inlined_call_operand.vmem [shape: f32[1,128], index: 4, kind: input, shape index: {}]   ;;  %s1292_s5 = inlined_call_operand.hbm [shape: bf16[128,128], index: 5, kind: input, shape index: {}]   ;;  %s1293_s6 = inlined_call_operand.vmem [shape: f32[1,128], index: 6, kind: input, shape index: {}]   ;;  %s1294_s7 = inlined_call_operand.hbm [shape: bf16[128,128], index: 7, kind: input, shape index: {}]   ;;  %s1295_s8 = inlined_call_operand.vmem [shape: f32[1,128], index: 8, kind: input, shape index: {}]   ;;  %s1296_s9 = inlined_call_operand.hbm [shape: bf16[128,128], index: 9, kind: input, shape index: {}]   ;;  %s1297_s10 = inlined_call_operand.vmem [shape: f32[1,128], index: 10, kind: input, shape index: {}]   ;;  %s1298_s11 = inlined_call_operand.vmem [shape: f32[8,128], index: 11, kind: output, shape index: {}]  }
   0x1   :  { %17 = vsyncpa [#allocation5], 0 }
   0x2   :  { %18 = vsyncpa [#allocation8], 0  ;;  %s1057_s17 = smov [#allocation4]   ;;  %s1058_s19 = smov [#allocation7]  }
   0x3   :  { %s40_s18 = sshll.u32 %s1057_s17, 4  ;;  %s68_s20 = sshll.u32 %s1058_s19, 4  ;;  %s41_s18 = int_to_ptr.vmem [resolvable:$true] %s40_s18  ;;  %s1127_s20 = int_to_ptr.vmem [resolvable:$true] %s68_s20 }
   0x4   :  { %s941_s23 = scalar_lea.hbm %s1290_s3, 1024 }
   0x5   :  { %p942_p0 = scmp.ne.s32.totalorder %s1290_s3, %s941_s23  ;;  %p945_p1 = scmp.lt.u32.totalorder %s941_s23, %s1290_s3 }
   0x7   :  { %p947_p2 = pnand %p945_p1, %p942_p0 }
   0x9   :  { %950 = shalt.err (!%p947_p2)
}
   0xa   :  { %s951_s28 = scalar_lea.vmem %s41_s18, 1024  ;;  %p956_p4 = scmp.lt.s32.totalorder %s41_s18, %s41_s18 }
   0xb   :  { %p952_p3 = scmp.ne.s32.totalorder %s41_s18, %s951_s28  ;;  %p957_p5 = scmp.lt.s32.totalorder %s951_s28, %s951_s28 }
   0xd   :  { %p958_p6 = por %p957_p5, %p956_p4 }
   0xf   :  { %p959_p7 = pnand %p958_p6, %p952_p3 }
  0x11   :  { %962 = shalt.err (!%p959_p7)
}
  0x12   :  { %s1059_s29 = smov 64   ;;  %s1060_s30 = smov 4  }
  0x13   :  { %46 = dma.hbm_to_vmem [thread:$0]  %s1290_s3, 1024, %s41_s18, [#allocation5], %s1059_s29, %s1059_s29, %s1060_s30  }
  0x14   :  { %s963_s16 = scalar_lea.hbm %s1294_s7, 1024 }
  0x15   :  { %p964_p8 = scmp.ne.s32.totalorder %s1294_s7, %s963_s16  ;;  %p967_p9 = scmp.lt.u32.totalorder %s963_s16, %s1294_s7 }
  0x17   :  { %p969_p10 = pnand %p967_p9, %p964_p8 }
  0x19   :  { %972 = shalt.err (!%p969_p10)
}
  0x1a   :  { %s973_s23 = scalar_lea.vmem %s1127_s20, 1024  ;;  %p978_p12 = scmp.lt.s32.totalorder %s1127_s20, %s1127_s20 }
  0x1b   :  { %p974_p11 = scmp.ne.s32.totalorder %s1127_s20, %s973_s23  ;;  %p979_p13 = scmp.lt.s32.totalorder %s973_s23, %s973_s23 }
  0x1d   :  { %p980_p0 = por %p979_p13, %p978_p12 }
  0x1f   :  { %p981_p1 = pnand %p980_p0, %p974_p11 }
  0x21   :  { %984 = shalt.err (!%p981_p1)
}
  0x22   :  { %74 = dma.hbm_to_vmem [thread:$0]  %s1294_s7, 1024, %s1127_s20, [#allocation8], %s1059_s29, %s1059_s29, %s1060_s30  }
  0x23   :  { %s1061_s24 = smov [#allocation2]   ;;  %s1062_s26 = smov [#allocation6]  }
  0x24   :  { %s26_s25 = sshll.u32 %s1061_s24, 4  ;;  %s54_s27 = sshll.u32 %s1062_s26, 4  ;;  %s27_s25 = int_to_ptr.vmem [resolvable:$true] %s26_s25  ;;  %s1164_s27 = int_to_ptr.vmem [resolvable:$true] %s54_s27 }
  0x25   :  { %s985_s13 = scalar_lea.hbm %s1288_s1, 1024 }
  0x26   :  { %p986_p2 = scmp.ne.s32.totalorder %s1288_s1, %s985_s13  ;;  %p989_p3 = scmp.lt.u32.totalorder %s985_s13, %s1288_s1 }
  0x28   :  { %p991_p4 = pnand %p989_p3, %p986_p2 }
  0x2a   :  { %994 = shalt.err (!%p991_p4)
}
  0x2b   :  { %s995_s7 = scalar_lea.vmem %s27_s25, 1024  ;;  %p1000_p6 = scmp.lt.s32.totalorder %s27_s25, %s27_s25 }
  0x2c   :  { %p996_p5 = scmp.ne.s32.totalorder %s27_s25, %s995_s7  ;;  %p1001_p7 = scmp.lt.s32.totalorder %s995_s7, %s995_s7 }
  0x2e   :  { %p1002_p8 = por %p1001_p7, %p1000_p6 }
  0x30   :  { %p1003_p9 = pnand %p1002_p8, %p996_p5 }
  0x32   :  { %1006 = shalt.err (!%p1003_p9)
}
  0x33   :  { %32 = dma.hbm_to_vmem [thread:$0]  %s1288_s1, 1024, %s27_s25, [#allocation3], %s1059_s29, %s1059_s29, %s1060_s30  }
  0x34   :  { %s1007_s23 = scalar_lea.hbm %s1292_s5, 1024 }
  0x35   :  { %p1008_p10 = scmp.ne.s32.totalorder %s1292_s5, %s1007_s23  ;;  %p1011_p11 = scmp.lt.u32.totalorder %s1007_s23, %s1292_s5 }
  0x37   :  { %p1013_p12 = pnand %p1011_p11, %p1008_p10 }
  0x39   :  { %1016 = shalt.err (!%p1013_p12)
}
  0x3a   :  { %s1017_s28 = scalar_lea.vmem %s1164_s27, 1024  ;;  %p1022_p0 = scmp.lt.s32.totalorder %s1164_s27, %s1164_s27 }
  0x3b   :  { %p1018_p13 = scmp.ne.s32.totalorder %s1164_s27, %s1017_s28  ;;  %p1023_p1 = scmp.lt.s32.totalorder %s1017_s28, %s1017_s28 }
  0x3d   :  { %p1024_p2 = por %p1023_p1, %p1022_p0 }
  0x3f   :  { %p1025_p3 = pnand %p1024_p2, %p1018_p13 }
  0x41   :  { %1028 = shalt.err (!%p1025_p3)
}
  0x42   :  { %60 = dma.hbm_to_vmem [thread:$0]  %s1292_s5, 1024, %s1164_s27, [#allocation5], %s1059_s29, %s1059_s29, %s1060_s30  }
  0x43   :  { %s1063_s12 = smov [#allocation9]   ;;  %s1029_s16 = scalar_lea.hbm %s1296_s9, 1024 }
  0x44   :  { %s82_s13 = sshll.u32 %s1063_s12, 4  ;;  %p1030_p4 = scmp.ne.s32.totalorder %s1296_s9, %s1029_s16  ;;  %s83_s13 = int_to_ptr.vmem [resolvable:$true] %s82_s13 }
  0x45   :  { %p1033_p5 = scmp.lt.u32.totalorder %s1029_s16, %s1296_s9 }
  0x47   :  { %p1035_p6 = pnand %p1033_p5, %p1030_p4 }
  0x49   :  { %1038 = shalt.err (!%p1035_p6)
}
  0x4a   :  { %s1039_s21 = scalar_lea.vmem %s83_s13, 1024  ;;  %p1044_p8 = scmp.lt.s32.totalorder %s83_s13, %s83_s13 }
  0x4b   :  { %p1040_p7 = scmp.ne.s32.totalorder %s83_s13, %s1039_s21  ;;  %p1045_p9 = scmp.lt.s32.totalorder %s1039_s21, %s1039_s21 }
  0x4d   :  { %p1046_p10 = por %p1045_p9, %p1044_p8 }
  0x4f   :  { %p1047_p11 = pnand %p1046_p10, %p1040_p7 }
  0x51   :  { %1050 = shalt.err (!%p1047_p11)
}
  0x52   :  { %88 = dma.hbm_to_vmem [thread:$0]  %s1296_s9, 1024, %s83_s13, [#allocation8], %s1059_s29, %s1059_s29, %s1060_s30  }
  0x53   :  { %1051 = dma.done.wait [#allocation3], 1024  }
  0x54   :  { %1052 = vsyncadd [#allocation3], 4294966272 }
  0x55   :  { %1053 = dma.done.wait [#allocation5], 2048  }
  0x56   :  { %1054 = vsyncadd [#allocation5], 4294965248 }
  0x57   :  { %1055 = dma.done.wait [#allocation8], 2048  }
  0x58   :  { %1056 = vsyncadd [#allocation8], 4294965248  ;;  %v1064_v0 = vmov 0.0   ;;  %vm1065_vm0 = vmmov 0   ;;  %v901_v1 = vld [vmem:[#allocation2] sm:$0xff]   ;;  %v902_v2 = vld [vmem:[#allocation2 + $0x8] sm:$0xff]  }
  0x59   :  { %789 = vmatprep.subr.bf16.mxu0 %v1064_v0  ;;  %805 = vmatprep.mubr.msk.bf16.mxu0 %vm1065_vm0, %v1064_v0  ;;  %v903_v3 = vld [vmem:[#allocation2 + $0x10] sm:$0xff]   ;;  %v909_v4 = vld [vmem:[#allocation4] sm:$0xff]   ;;  %v904_v5 = vld [vmem:[#allocation2 + $0x18] sm:$0xff]  }
  0x5a   :  { %809 = vmatprep.subr.bf16.mxu1 %v1064_v0  ;;  %825 = vmatprep.mubr.msk.bf16.mxu1 %vm1065_vm0, %v1064_v0  ;;  %v910_v6 = vld [vmem:[#allocation4 + $0x8] sm:$0xff]   ;;  %v905_v7 = vld [vmem:[#allocation2 + $0x20] sm:$0xff]   ;;  %v911_v8 = vld [vmem:[#allocation4 + $0x10] sm:$0xff]  }
  0x5b   :  { %790 = vmatpush3.bf16.msra.mxu0 %v901_v1  ;;  %810 = vmatpush3.bf16.msra.mxu1 %v909_v4  ;;  %v906_v9 = vld [vmem:[#allocation2 + $0x28] sm:$0xff]   ;;  %v912_v10 = vld [vmem:[#allocation4 + $0x18] sm:$0xff]   ;;  %v907_v11 = vld [vmem:[#allocation2 + $0x30] sm:$0xff]  }
  0x5c   :  { %791 = vmatprep.subr.bf16.mxu0 %v1064_v0  ;;  %811 = vmatprep.subr.bf16.mxu1 %v1064_v0  ;;  %v913_v12 = vld [vmem:[#allocation4 + $0x20] sm:$0xff]   ;;  %v908_v13 = vld [vmem:[#allocation2 + $0x38] sm:$0xff]   ;;  %v914_v14 = vld [vmem:[#allocation4 + $0x28] sm:$0xff]  }
  0x5d   :  { %v107_v15 = vld [vmem:[%s1287_s0] sm:$0xf]  ;;  %v915_v16 = vld [vmem:[#allocation4 + $0x30] sm:$0xff]   ;;  %v916_v17 = vld [vmem:[#allocation4 + $0x38] sm:$0xff]  }
  0x5e   :  { %v917_v18 = vld [vmem:[#allocation6] sm:$0xff]   ;;  %v918_v19 = vld [vmem:[#allocation6 + $0x8] sm:$0xff]   ;;  %v919_v20 = vld [vmem:[#allocation6 + $0x10] sm:$0xff]  }
  0x5f   :  { %792 = vmatpush3.bf16.msra.mxu0 %v902_v2  ;;  %812 = vmatpush3.bf16.msra.mxu1 %v910_v6  ;;  %v920_v21 = vld [vmem:[#allocation6 + $0x18] sm:$0xff]   ;;  %v921_v22 = vld [vmem:[#allocation6 + $0x20] sm:$0xff]   ;;  %v922_v23 = vld [vmem:[#allocation6 + $0x28] sm:$0xff]  }
  0x60   :  { %793 = vmatprep.subr.bf16.mxu0 %v1064_v0  ;;  %813 = vmatprep.subr.bf16.mxu1 %v1064_v0  ;;  %v699_v24 = vld [vmem:[%s1289_s2] ss:$0 sm:$0xff]  ;;  %v923_v32 = vld [vmem:[#allocation6 + $0x30] sm:$0xff]   ;;  %v924_v33 = vld [vmem:[#allocation6 + $0x38] sm:$0xff]  }
  0x61   :  { %v925_v34 = vld [vmem:[#allocation7] sm:$0xff]   ;;  %v926_v35 = vld [vmem:[#allocation7 + $0x8] sm:$0xff]   ;;  %v927_v36 = vld [vmem:[#allocation7 + $0x10] sm:$0xff]  }
  0x62   :  { %v928_v37 = vld [vmem:[#allocation7 + $0x18] sm:$0xff]   ;;  %v929_v38 = vld [vmem:[#allocation7 + $0x20] sm:$0xff]   ;;  %v930_v39 = vld [vmem:[#allocation7 + $0x28] sm:$0xff]  }
  0x63   :  { %794 = vmatpush3.bf16.msra.mxu0 %v903_v3  ;;  %814 = vmatpush3.bf16.msra.mxu1 %v911_v8  ;;  %v708_v40 = vld [vmem:[%s1291_s4] ss:$0 sm:$0xff]  ;;  %v931_v48 = vld [vmem:[#allocation7 + $0x30] sm:$0xff]   ;;  %v932_v49 = vld [vmem:[#allocation7 + $0x38] sm:$0xff]  }
  0x64   :  { %795 = vmatprep.subr.bf16.mxu0 %v1064_v0  ;;  %815 = vmatprep.subr.bf16.mxu1 %v1064_v0  ;;  %v933_v50 = vld [vmem:[#allocation9] sm:$0xff]   ;;  %v934_v51 = vld [vmem:[#allocation9 + $0x8] sm:$0xff]   ;;  %v935_v52 = vld [vmem:[#allocation9 + $0x10] sm:$0xff]  }
  0x65   :  { %v936_v53 = vld [vmem:[#allocation9 + $0x18] sm:$0xff]   ;;  %v937_v54 = vld [vmem:[#allocation9 + $0x20] sm:$0xff]   ;;  %v938_v55 = vld [vmem:[#allocation9 + $0x28] sm:$0xff]  }
  0x66   :  { %v717_v56 = vld [vmem:[%s1293_s6] ss:$0 sm:$0xff]  ;;  %v939_v1 = vld [vmem:[#allocation9 + $0x30] sm:$0xff]   ;;  %v940_v2 = vld [vmem:[#allocation9 + $0x38] sm:$0xff]  }
  0x67   :  { %796 = vmatpush3.bf16.msra.mxu0 %v904_v5  ;;  %816 = vmatpush3.bf16.msra.mxu1 %v912_v10  ;;  %v726_v3 = vld [vmem:[%s1295_s8] ss:$0 sm:$0xff] }
  0x68   :  { %797 = vmatprep.subr.bf16.mxu0 %v1064_v0  ;;  %817 = vmatprep.subr.bf16.mxu1 %v1064_v0 }
  0x6b   :  { %798 = vmatpush3.bf16.msra.mxu0 %v905_v7  ;;  %818 = vmatpush3.bf16.msra.mxu1 %v913_v12 }
  0x6c   :  { %799 = vmatprep.subr.bf16.mxu0 %v1064_v0  ;;  %819 = vmatprep.subr.bf16.mxu1 %v1064_v0 }
  0x6f   :  { %800 = vmatpush3.bf16.msra.mxu0 %v906_v9  ;;  %820 = vmatpush3.bf16.msra.mxu1 %v914_v14 }
  0x70   :  { %801 = vmatprep.subr.bf16.mxu0 %v1064_v0  ;;  %821 = vmatprep.subr.bf16.mxu1 %v1064_v0 }
  0x73   :  { %802 = vmatpush3.bf16.msra.mxu0 %v907_v11  ;;  %822 = vmatpush3.bf16.msra.mxu1 %v915_v16  ;;  %v1066_v11 = vmov 0  }
  0x74   :  { %803 = vmatprep.subr.bf16.mxu0 %v1064_v0  ;;  %823 = vmatprep.subr.bf16.mxu1 %v1064_v0 }
  0x75   :  { %899 = vset.pattern.permute.xlu0 %v1066_v11  ;;  %900 = vset.pattern.permute.xlu1 %v1066_v11 }
  0x77   :  { %804 = vmatpush3.bf16.msra.mxu0 %v908_v13  ;;  %824 = vmatpush3.bf16.msra.mxu1 %v916_v17 }
  0x78   :  { %829 = vmatprep.subr.bf16.mxu0 %v1064_v0  ;;  %849 = vmatprep.subr.bf16.mxu1 %v1064_v0 }
  0x7a   :  { %806 = vmatmul.mubr.bf16.vlgmr.msra.gmra.mrb[0].mxu0 %v107_v15 }
  0x7b   :  { %845 = vmatprep.mubr.msk.bf16.mxu0 %vm1065_vm0, %v1064_v0  ;;  %830 = vmatpush3.bf16.msra.mxu0 %v917_v18 }
  0x7c   :  { %831 = vmatprep.subr.bf16.mxu0 %v1064_v0 }
  0x7f   :  { %832 = vmatpush3.bf16.msra.mxu0 %v918_v19 }
  0x80   :  { %833 = vmatprep.subr.bf16.mxu0 %v1064_v0 }
  0x83   :  { %834 = vmatpush3.bf16.msra.mxu0 %v919_v20  ;;  %v675_v20 = vlaneseq }
  0x84   :  { %835 = vmatprep.subr.bf16.mxu0 %v1064_v0 }
  0x87   :  { %836 = vmatpush3.bf16.msra.mxu0 %v920_v21 }
  0x88   :  { %837 = vmatprep.subr.bf16.mxu0 %v1064_v0 }
  0x8b   :  { %838 = vmatpush3.bf16.msra.mxu0 %v921_v22  ;;  %v676_v22 = vand.u32 127, %v675_v20 }
  0x8c   :  { %839 = vmatprep.subr.bf16.mxu0 %v1064_v0 }
  0x8d   :  { %vm677_vm1 = vcmp.eq.s32.totalorder %v676_v22, 0 }
  0x8f   :  { %840 = vmatpush3.bf16.msra.mxu0 %v922_v23 }
  0x90   :  { %841 = vmatprep.subr.bf16.mxu0 %v1064_v0 }
  0x93   :  { %842 = vmatpush3.bf16.msra.mxu0 %v923_v32 }
  0x94   :  { %843 = vmatprep.subr.bf16.mxu0 %v1064_v0 }
  0x97   :  { %844 = vmatpush3.bf16.msra.mxu0 %v924_v33 }
  0x98   :  { %869 = vmatprep.subr.bf16.mxu0 %v1064_v0 }
 0x14d   :  { %v213_v25 = vpop.f32.mrb[0].mxu0 }
 0x14e   :  { %v214_v26 = vadd.f32 %v699_v24, %v213_v25  ;;  %v807_v27 = vpop.f32.mrb[1].mxu0 }
 0x14f   :  { %v216_v28 = vpop.f32.mrb[2].mxu0 }
 0x150   :  { %v219_v29 = vmax.f32 %v214_v26, 0.0  ;;  %v808_v30 = vpop.f32.mrb[3].mxu0 }
 0x152   :  { %v220_v31 = vpack.c.bf16 %v219_v29, %v219_v29 }
 0x154   :  { %826 = vmatmul.mubr.bf16.vlgmr.msra.gmra.mrb[0].mxu1 %v220_v31 }
 0x155   :  { %865 = vmatprep.mubr.msk.bf16.mxu1 %vm1065_vm0, %v1064_v0  ;;  %850 = vmatpush3.bf16.msra.mxu1 %v925_v34 }
 0x156   :  { %851 = vmatprep.subr.bf16.mxu1 %v1064_v0 }
 0x159   :  { %852 = vmatpush3.bf16.msra.mxu1 %v926_v35 }
 0x15a   :  { %853 = vmatprep.subr.bf16.mxu1 %v1064_v0 }
 0x15d   :  { %854 = vmatpush3.bf16.msra.mxu1 %v927_v36 }
 0x15e   :  { %855 = vmatprep.subr.bf16.mxu1 %v1064_v0 }
 0x161   :  { %856 = vmatpush3.bf16.msra.mxu1 %v928_v37 }
 0x162   :  { %857 = vmatprep.subr.bf16.mxu1 %v1064_v0 }
 0x165   :  { %858 = vmatpush3.bf16.msra.mxu1 %v929_v38 }
 0x166   :  { %859 = vmatprep.subr.bf16.mxu1 %v1064_v0 }
 0x169   :  { %860 = vmatpush3.bf16.msra.mxu1 %v930_v39 }
 0x16a   :  { %861 = vmatprep.subr.bf16.mxu1 %v1064_v0 }
 0x16d   :  { %862 = vmatpush3.bf16.msra.mxu1 %v931_v48 }
 0x16e   :  { %863 = vmatprep.subr.bf16.mxu1 %v1064_v0 }
 0x171   :  { %864 = vmatpush3.bf16.msra.mxu1 %v932_v49 }
 0x227   :  { %v326_v41 = vpop.f32.mrb[0].mxu1 }
 0x228   :  { %v327_v42 = vadd.f32 %v708_v40, %v326_v41  ;;  %v827_v43 = vpop.f32.mrb[1].mxu1 }
 0x229   :  { %v329_v44 = vpop.f32.mrb[2].mxu1 }
 0x22a   :  { %v332_v45 = vmax.f32 %v327_v42, 0.0  ;;  %v828_v46 = vpop.f32.mrb[3].mxu1 }
 0x22c   :  { %v333_v47 = vpack.c.bf16 %v332_v45, %v332_v45 }
 0x22e   :  { %846 = vmatmul.mubr.bf16.vlgmr.msra.gmra.mrb[4].mxu0 %v333_v47 }
 0x22f   :  { %885 = vmatprep.mubr.msk.bf16.mxu0 %vm1065_vm0, %v1064_v0  ;;  %870 = vmatpush3.bf16.msra.mxu0 %v933_v50 }
 0x230   :  { %871 = vmatprep.subr.bf16.mxu0 %v1064_v0 }
 0x233   :  { %872 = vmatpush3.bf16.msra.mxu0 %v934_v51 }
 0x234   :  { %873 = vmatprep.subr.bf16.mxu0 %v1064_v0 }
 0x237   :  { %874 = vmatpush3.bf16.msra.mxu0 %v935_v52 }
 0x238   :  { %875 = vmatprep.subr.bf16.mxu0 %v1064_v0 }
 0x23b   :  { %876 = vmatpush3.bf16.msra.mxu0 %v936_v53 }
 0x23c   :  { %877 = vmatprep.subr.bf16.mxu0 %v1064_v0 }
 0x23f   :  { %878 = vmatpush3.bf16.msra.mxu0 %v937_v54 }
 0x240   :  { %879 = vmatprep.subr.bf16.mxu0 %v1064_v0 }
 0x243   :  { %880 = vmatpush3.bf16.msra.mxu0 %v938_v55 }
 0x244   :  { %881 = vmatprep.subr.bf16.mxu0 %v1064_v0 }
 0x247   :  { %882 = vmatpush3.bf16.msra.mxu0 %v939_v1 }
 0x248   :  { %883 = vmatprep.subr.bf16.mxu0 %v1064_v0  ;;  %v735_v0 = vld [vmem:[%s1297_s10] ss:$0 sm:$0xff] }
 0x24b   :  { %884 = vmatpush3.bf16.msra.mxu0 %v940_v2 }
 0x301   :  { %v439_v57 = vpop.f32.mrb[4].mxu0 }
 0x302   :  { %v440_v58 = vadd.f32 %v717_v56, %v439_v57  ;;  %v847_v59 = vpop.f32.mrb[5].mxu0 }
 0x303   :  { %v442_v60 = vpop.f32.mrb[6].mxu0 }
 0x304   :  { %v445_v61 = vmax.f32 %v440_v58, 0.0  ;;  %v848_v62 = vpop.f32.mrb[7].mxu0 }
 0x306   :  { %v446_v63 = vpack.c.bf16 %v445_v61, %v445_v61 }
 0x308   :  { %866 = vmatmul.mubr.bf16.vlgmr.msra.gmra.mrb[4].mxu1 %v446_v63 }
 0x3db   :  { %v552_v4 = vpop.f32.mrb[4].mxu1 }
 0x3dc   :  { %v553_v5 = vadd.f32 %v726_v3, %v552_v4  ;;  %v867_v6 = vpop.f32.mrb[5].mxu1 }
 0x3dd   :  { %v555_v7 = vpop.f32.mrb[6].mxu1 }
 0x3de   :  { %v558_v8 = vmax.f32 %v553_v5, 0.0  ;;  %v868_v9 = vpop.f32.mrb[7].mxu1 }
 0x3e0   :  { %v559_v10 = vpack.c.bf16 %v558_v8, %v558_v8 }
 0x3e2   :  { %886 = vmatmul.mubr.bf16.vlgmr.msra.gmra.mrb[8].mxu0 %v559_v10 }
 0x4b5   :  { %v665_v12 = vpop.f32.mrb[8].mxu0 }
 0x4b6   :  { %v666_v13 = vadd.f32 %v735_v0, %v665_v12  ;;  %v887_v14 = vpop.f32.mrb[9].mxu0 }
 0x4b7   :  { %v668_v15 = vpop.f32.mrb[10].mxu0 }
 0x4b8   :  { %671 = vadd.xlane.f32.xlu0 %v666_v13  ;;  %v888_v16 = vpop.f32.mrb[11].mxu0 }
 0x4ce   :  { %680 = vperm.xlu0 %899, %v666_v13  }
 0x545   :  { %v672_v17 = vpop.xlane.xlu0 %671 }
 0x546   :  { %v673_v18 = vsub.f32 %v672_v17, %v666_v13 }
 0x548   :  { %v674_v19 = vmul.f32 0.25, %v673_v18 }
 0x54a   :  { %686 = vperm.xlu1 %900, %v674_v19  }
 0x54d   :  { %v681_v21 = vpop.permute.xlu0 %680 }
 0x54e   :  { %v683_v23 = vadd.f32 %v681_v21, %v666_v13 }
 0x5c9   :  { %v687_v24 = vpop.permute.xlu1 %686 }
 0x5ca   :  { %v689_v25 = vsub.f32 %v683_v23, %v687_v24 }
 0x5cc   :  { %v690_v26 = vsel %vm677_vm1, %v666_v13, %v689_v25 }
 0x5cd   :  { %691 = vst [vmem:[%s1298_s11] sm:$0xff] %v690_v26 }
 0x5ce   :  { %696 = vsyncpa [#allocation3], 1 }
 0x5cf   :  { %697 = vsyncpa [#allocation5], 1 }
 0x5d0   :  { %698 = vsyncpa [#allocation8], 1 }

</bundles_post_ra>
